<compile_context>
chip_gen: v5e
topology: v5e:2x2
jax: 0.10.0
libtpu: 0.0.40
codegen_flags: <defaults>
</compile_context>

<pallas_src>
import jax
import jax.numpy as jnp
from jax.experimental import pallas as pl
from jax.experimental.pallas import tpu as pltpu


def _round_up(v, m):
    return ((v + m - 1) // m) * m


def _global_mlp_kernel(x_ref, w1_ref, b1_ref, w2_ref, b2_ref, out_ref, acc_ref):
    # Grid: (batch_tiles, k_tiles) with the layer-1 contraction (P) tiled on k.
    # x_ref : (TM, TK)   bf16   pooled+flattened activations (batch tile, K slab)
    # w1_ref: (TK, H1p)  bf16   b1_ref: (1, H1p) f32
    # w2_ref: (H1p, Op)  bf16   b2_ref: (1, Op)  f32
    # out_ref: (TM, Op)  f32    acc_ref: (TM, H1p) f32 scratch accumulator
    k = pl.program_id(1)

    @pl.when(k == 0)
    def _():
        acc_ref[...] = jnp.zeros_like(acc_ref)

    acc_ref[...] += jnp.dot(x_ref[...], w1_ref[...],
                            preferred_element_type=jnp.float32)

    @pl.when(k == pl.num_programs(1) - 1)
    def _():
        h = jnp.maximum(acc_ref[...] + b1_ref[...], 0.0)          # Linear1 + ReLU
        o = jnp.dot(h.astype(w2_ref.dtype), w2_ref[...],
                    preferred_element_type=jnp.float32)
        out_ref[...] = jnp.maximum(o + b2_ref[...], 0.0).astype(out_ref.dtype)


def prepare_params(params, *, w1_tile_bytes=4 << 20):
    """One-time: pad to lane-dense multiples of 128 and cast weights to bf16.

    Zero padding is numerically exact (zero weights + zero bias -> ReLU(0)=0).
    Returns a dict consumed by global_pooling_forward.
    """
    w1 = params["w1"]
    b1 = params["b1"]
    w2 = params["w2"]
    b2 = params["b2"]
    P, H1 = w1.shape
    O = w2.shape[1]
    H1p = _round_up(H1, 128)
    Op = _round_up(O, 128)

    # K tile over the layer-1 contraction dim: bound each (TK, H1p) bf16 w1
    # slab to ~w1_tile_bytes so it double-buffers comfortably in VMEM.
    TK = max(128, (w1_tile_bytes // (H1p * 2)) // 128 * 128)
    TK = min(TK, _round_up(P, 128))
    Pp = _round_up(P, TK)

    w1_p = jnp.pad(w1.astype(jnp.bfloat16), ((0, Pp - P), (0, H1p - H1)))
    b1_p = jnp.pad(b1.astype(jnp.float32), (0, H1p - H1)).reshape(1, H1p)
    w2_p = jnp.pad(w2.astype(jnp.bfloat16), ((0, H1p - H1), (0, Op - O)))
    b2_p = jnp.pad(b2.astype(jnp.float32), (0, Op - O)).reshape(1, Op)

    return {
        "w1": w1_p, "b1": b1_p, "w2": w2_p, "b2": b2_p,
        "dims": (P, H1, O, Pp, H1p, Op, TK),
    }


def global_pooling_forward(x, prepared, inplanes, *, tm=256):
    """x: (N, C, H, W) float32, NCHW as in PyTorch.

    prepared: output of prepare_params (pre-padded, pre-cast weights).
    inplanes: (oh, ow) adaptive-pool output size (must divide H, W here).
    """
    N, C, H, W = x.shape
    oh, ow = inplanes
    assert H % oh == 0 and W % ow == 0, \
        "kernel assumes evenly-divisible adaptive pooling windows"
    # TODO(synk): non-divisible AdaptiveAvgPool2d window sizes are not handled.
    kh, kw = H // oh, W // ow

    P, H1, O, Pp, H1p, Op, TK = prepared["dims"]
    assert C * oh * ow == P, "params were prepared for a different inter_plane"

    # AdaptiveAvgPool2d + flatten in XLA (fused reshape+mean; no transpose, no
    # (N, P, K) intermediate).  Flatten order matches torch's .view(B, -1).
    pooled = x.reshape(N, C, oh, kh, ow, kw).mean(axis=(3, 5))
    pooled = pooled.reshape(N, P).astype(jnp.bfloat16)

    # Batch tile: multiple of 16 (bf16 sublane packing).  Split so the batch
    # grid has >= 2 tiles when N allows it (keeps v7x's 2nd TensorCore busy).
    if N >= 2 * tm:
        TM = tm
    else:
        TM = min(tm, _round_up(-(-N // 2), 16))
        if TM >= N:
            TM = _round_up(N, 16)
    Np = _round_up(N, TM)

    x_p = pooled
    if Np > N or Pp > P:
        x_p = jnp.pad(pooled, ((0, Np - N), (0, Pp - P)))

    n_bt = Np // TM
    n_kt = Pp // TK

    w1_p, b1_p = prepared["w1"], prepared["b1"]
    w2_p, b2_p = prepared["w2"], prepared["b2"]

    # Explicit VMEM budget (default scoped limits are far below physical).
    vmem_bytes = (
        2 * TM * TK * 2                        # x tile, double-buffered bf16
        + 2 * TK * H1p * 2                     # w1 tile, double-buffered bf16
        + H1p * 4 + H1p * Op * 2 + Op * 4      # b1 / w2 / b2, single-buffered
        + 2 * TM * Op * 4                      # out tile, double-buffered f32
        + TM * H1p * 4                         # f32 accumulator scratch
        + TM * H1p * 2 + TM * Op * 4           # internal bf16 h copy + f32 o
    )
    vmem_limit = min(int(vmem_bytes * 5 // 4) + (2 << 20), 100 << 20)

    cost = pl.CostEstimate(
        flops=2 * Np * (Pp * H1p + H1p * Op),
        transcendentals=0,
        bytes_accessed=(Np * Pp * 2 + Pp * H1p * 2 + H1p * Op * 2
                        + (H1p + Op) * 4 + Np * Op * 4),
    )

    const_map = lambda i, k: (0, 0)
    out = pl.pallas_call(
        _global_mlp_kernel,
        out_shape=jax.ShapeDtypeStruct((Np, Op), jnp.float32),
        grid=(n_bt, n_kt),
        in_specs=[
            pl.BlockSpec((TM, TK), lambda i, k: (i, k)),      # activations
            pl.BlockSpec((TK, H1p), lambda i, k: (k, 0)),     # w1 K slab
            pl.BlockSpec((1, H1p), const_map,
                         pipeline_mode=pl.Buffered(1)),       # b1 (resident)
            pl.BlockSpec((H1p, Op), const_map,
                         pipeline_mode=pl.Buffered(1)),       # w2 (resident)
            pl.BlockSpec((1, Op), const_map,
                         pipeline_mode=pl.Buffered(1)),       # b2 (resident)
        ],
        out_specs=pl.BlockSpec((TM, Op), lambda i, k: (i, 0)),
        scratch_shapes=[pltpu.VMEM((TM, H1p), jnp.float32)],
        compiler_params=pltpu.CompilerParams(
            dimension_semantics=("parallel", "arbitrary"),
            vmem_limit_bytes=vmem_limit,
        ),
        cost_estimate=cost,
    )(x_p, w1_p, b1_p, w2_p, b2_p)

    return out[:N, :O]


def _xavier_uniform(key, fan_in, fan_out, dtype=jnp.float32):
    # matches nn.init.xavier_uniform_ (gain=1)
    limit = (6.0 / (fan_in + fan_out)) ** 0.5
    return jax.random.uniform(key, (fan_in, fan_out), dtype, -limit, limit)


def init_params(key, inter_plane, hidden, outchannels):
    k1, k2 = jax.random.split(key)
    return {
        # stored pre-transposed: y = x @ w + b   (PyTorch: y = x @ W.T + b)
        "w1": _xavier_uniform(k1, inter_plane, hidden),
        "b1": jnp.full((hidden,), 0.01, jnp.float32),
        "w2": _xavier_uniform(k2, hidden, outchannels),
        "b2": jnp.full((outchannels,), 0.01, jnp.float32),
    }


if __name__ == "__main__":
    # Small, consistent configuration:
    #   inplanes       = (4, 4)     adaptive-pool output size
    #   inter_channels = [4, 32]    (inter_channels[0] == C of the input)
    #   outchannels    = 16
    N, C, H, W = 2, 4, 16, 16
    inplanes = (4, 4)
    inter_channels = [C, 32]
    outchannels = 16
    inter_plane = inter_channels[0] * inplanes[0] * inplanes[1]   # 64

    key = jax.random.PRNGKey(0)
    kx, kp = jax.random.split(key)
    x = jax.random.normal(kx, (N, C, H, W), jnp.float32)
    params = init_params(kp, inter_plane, inter_channels[1], outchannels)

    # One-time weight preparation (pad + bf16 cast) -- hoisted out of forward.
    prepared = prepare_params(params)

    out = global_pooling_forward(x, prepared, inplanes)
    out = jax.block_until_ready(out)
    assert out.shape == (N, outchannels)

    # Pure-JAX references (eval-mode dropout == identity).
    kh, kw = H // inplanes[0], W // inplanes[1]
    pooled = x.reshape(N, C, inplanes[0], kh, inplanes[1], kw).mean(axis=(3, 5))
    flat = pooled.reshape(N, -1)

    # (a) bf16-MXU-path reference (same dtype path as the kernel) -> tight check
    h_bf = jnp.dot(flat.astype(jnp.bfloat16), params["w1"].astype(jnp.bfloat16),
                   preferred_element_type=jnp.float32)
    h_bf = jnp.maximum(h_bf + params["b1"], 0.0)
    o_bf = jnp.dot(h_bf.astype(jnp.bfloat16), params["w2"].astype(jnp.bfloat16),
                   preferred_element_type=jnp.float32)
    ref_bf = jnp.maximum(o_bf + params["b2"], 0.0)
    assert jnp.allclose(out, ref_bf, atol=1e-4, rtol=1e-4)

    # (b) full-f32 module reference -> loose check (bf16 quantization error only)
    ref = jnp.maximum(flat @ params["w1"] + params["b1"], 0.0)
    ref = jnp.maximum(ref @ params["w2"] + params["b2"], 0.0)
    assert jnp.allclose(out, ref, atol=5e-2, rtol=5e-2)

    # TODO(synk): training-mode Dropout (stochastic masking) is not reproduced;
    # eval-mode (identity) semantics are implemented.
    print("KERNEL_OK")
</pallas_src>

<mosaic_0001>
module attributes {stable_mosaic.version = 11 : i64} {
  func.func @_global_mlp_kernel(%arg0: i32, %arg1: i32, %arg2: memref<16x128xbf16, #tpu.memory_space<vmem>>, %arg3: memref<128x128xbf16, #tpu.memory_space<vmem>>, %arg4: memref<1x128xf32, #tpu.memory_space<vmem>>, %arg5: memref<128x128xbf16, #tpu.memory_space<vmem>>, %arg6: memref<1x128xf32, #tpu.memory_space<vmem>>, %arg7: memref<16x128xf32, #tpu.memory_space<vmem>>, %arg8: memref<16x128xf32, #tpu.memory_space<vmem>>) attributes {dimension_semantics = [#tpu.dimension_semantics<parallel>, #tpu.dimension_semantics<arbitrary>], iteration_bounds = array<i64: 1, 1>, scalar_prefetch = 0 : i64, scratch_operands = 1 : i64, tpu.core_type = #tpu.core_type<tc>, window_params = [{transform_indices = @transform_0, window_bounds = array<i64: 16, 128>}, {transform_indices = @transform_1, window_bounds = array<i64: 128, 128>}, {pipeline_mode = #tpu.pipeline_mode<synchronous>, transform_indices = @transform_2, window_bounds = array<i64: 1, 128>}, {pipeline_mode = #tpu.pipeline_mode<synchronous>, transform_indices = @transform_3, window_bounds = array<i64: 128, 128>}, {pipeline_mode = #tpu.pipeline_mode<synchronous>, transform_indices = @transform_4, window_bounds = array<i64: 1, 128>}, {transform_indices = @transform_5, window_bounds = array<i64: 16, 128>}]} {
    %c0_i32 = arith.constant 0 : i32
    %0 = arith.cmpi eq, %arg1, %c0_i32 : i32
    %1 = arith.extui %0 : i1 to i32
    %c0_i32_0 = arith.constant 0 : i32
    %2 = arith.cmpi ne, %1, %c0_i32_0 : i32
    scf.if %2 {
      %cst_10 = arith.constant 0.000000e+00 : f32
      %12 = vector.broadcast %cst_10 : f32 to vector<16x128xf32>
      %c0_11 = arith.constant 0 : index
      %c0_12 = arith.constant 0 : index
      %13 = vector.load %arg8[%c0_11, %c0_12] : memref<16x128xf32, #tpu.memory_space<vmem>>, vector<16x128xf32>
      tpu.vector_store %arg8[%c0_11, %c0_12], %12 {strides = array<i32>} : memref<16x128xf32, #tpu.memory_space<vmem>>, vector<16x128xf32>,
    } else {
    }
    %c0 = arith.constant 0 : index
    %c0_1 = arith.constant 0 : index
    %3 = vector.load %arg8[%c0, %c0_1] : memref<16x128xf32, #tpu.memory_space<vmem>>, vector<16x128xf32>
    %c0_2 = arith.constant 0 : index
    %c0_3 = arith.constant 0 : index
    %4 = vector.load %arg2[%c0_2, %c0_3] : memref<16x128xbf16, #tpu.memory_space<vmem>>, vector<16x128xbf16>
    %c0_4 = arith.constant 0 : index
    %c0_5 = arith.constant 0 : index
    %5 = vector.load %arg3[%c0_4, %c0_5] : memref<128x128xbf16, #tpu.memory_space<vmem>>, vector<128x128xbf16>
    %cst = arith.constant dense<0.000000e+00> : vector<16x128xf32>
    %6 = tpu.matmul %4, %5, %cst {dimension_numbers = #tpu.dot_dimension_numbers<[1], [0], [0], [1], [0, 0, 1, 1], [], []>} : vector<16x128xbf16>, vector<128x128xbf16>, vector<16x128xf32> -> vector<16x128xf32>
    %7 = arith.addf %3, %6 : vector<16x128xf32>
    %c0_6 = arith.constant 0 : index
    %c0_7 = arith.constant 0 : index
    %8 = vector.load %arg8[%c0_6, %c0_7] : memref<16x128xf32, #tpu.memory_space<vmem>>, vector<16x128xf32>
    tpu.vector_store %arg8[%c0_6, %c0_7], %7 {strides = array<i32>} : memref<16x128xf32, #tpu.memory_space<vmem>>, vector<16x128xf32>,
    %c0_i32_8 = arith.constant 0 : i32
    %9 = arith.cmpi eq, %arg1, %c0_i32_8 : i32
    %10 = arith.extui %9 : i1 to i32
    %c0_i32_9 = arith.constant 0 : i32
    %11 = arith.cmpi ne, %10, %c0_i32_9 : i32
    scf.if %11 {
      %c0_10 = arith.constant 0 : index
      %c0_11 = arith.constant 0 : index
      %12 = vector.load %arg8[%c0_10, %c0_11] : memref<16x128xf32, #tpu.memory_space<vmem>>, vector<16x128xf32>
      %c0_12 = arith.constant 0 : index
      %c0_13 = arith.constant 0 : index
      %13 = vector.load %arg4[%c0_12, %c0_13] : memref<1x128xf32, #tpu.memory_space<vmem>>, vector<1x128xf32>
      %14 = vector.broadcast %13 : vector<1x128xf32> to vector<16x128xf32>
      %15 = arith.addf %12, %14 : vector<16x128xf32>
      %cst_14 = arith.constant 0.000000e+00 : f32
      %16 = vector.broadcast %cst_14 : f32 to vector<16x128xf32>
      %17 = arith.maximumf %15, %16 : vector<16x128xf32>
      %18 = arith.truncf %17 : vector<16x128xf32> to vector<16x128xbf16>
      %c0_15 = arith.constant 0 : index
      %c0_16 = arith.constant 0 : index
      %19 = vector.load %arg5[%c0_15, %c0_16] : memref<128x128xbf16, #tpu.memory_space<vmem>>, vector<128x128xbf16>
      %cst_17 = arith.constant dense<0.000000e+00> : vector<16x128xf32>
      %20 = tpu.matmul %18, %19, %cst_17 {dimension_numbers = #tpu.dot_dimension_numbers<[1], [0], [0], [1], [0, 0, 1, 1], [], []>} : vector<16x128xbf16>, vector<128x128xbf16>, vector<16x128xf32> -> vector<16x128xf32>
      %c0_18 = arith.constant 0 : index
      %c0_19 = arith.constant 0 : index
      %21 = vector.load %arg6[%c0_18, %c0_19] : memref<1x128xf32, #tpu.memory_space<vmem>>, vector<1x128xf32>
      %22 = vector.broadcast %21 : vector<1x128xf32> to vector<16x128xf32>
      %23 = arith.addf %20, %22 : vector<16x128xf32>
      %cst_20 = arith.constant 0.000000e+00 : f32
      %24 = vector.broadcast %cst_20 : f32 to vector<16x128xf32>
      %25 = arith.maximumf %23, %24 : vector<16x128xf32>
      %c0_21 = arith.constant 0 : index
      %c0_22 = arith.constant 0 : index
      %26 = vector.load %arg7[%c0_21, %c0_22] : memref<16x128xf32, #tpu.memory_space<vmem>>, vector<16x128xf32>
      tpu.vector_store %arg7[%c0_21, %c0_22], %25 {strides = array<i32>} : memref<16x128xf32, #tpu.memory_space<vmem>>, vector<16x128xf32>,
    } else {
    }
    return
  }
  func.func @transform_0(%arg0: i32, %arg1: i32) -> (i32, i32) {
    %c0_i32 = arith.constant 0 : i32
    return %arg0, %arg1 : i32, i32
  }
  func.func @transform_1(%arg0: i32, %arg1: i32) -> (i32, i32) {
    %c0_i32 = arith.constant 0 : i32
    %c0_i32_0 = arith.constant 0 : i32
    return %arg1, %c0_i32 : i32, i32
  }
  func.func @transform_2(%arg0: i32, %arg1: i32) -> (i32, i32) {
    %c0_i32 = arith.constant 0 : i32
    %c0_i32_0 = arith.constant 0 : i32
    %c0_i32_1 = arith.constant 0 : i32
    return %c0_i32, %c0_i32_0 : i32, i32
  }
  func.func @transform_3(%arg0: i32, %arg1: i32) -> (i32, i32) {
    %c0_i32 = arith.constant 0 : i32
    %c0_i32_0 = arith.constant 0 : i32
    %c0_i32_1 = arith.constant 0 : i32
    return %c0_i32, %c0_i32_0 : i32, i32
  }
  func.func @transform_4(%arg0: i32, %arg1: i32) -> (i32, i32) {
    %c0_i32 = arith.constant 0 : i32
    %c0_i32_0 = arith.constant 0 : i32
    %c0_i32_1 = arith.constant 0 : i32
    return %c0_i32, %c0_i32_0 : i32, i32
  }
  func.func @transform_5(%arg0: i32, %arg1: i32) -> (i32, i32) {
    %c0_i32 = arith.constant 0 : i32
    %c0_i32_0 = arith.constant 0 : i32
    return %arg0, %c0_i32 : i32, i32
  }
}

</mosaic_0001>

<bundles_post_ra>
// kernel: tpu_custom_call.1
= control target key start
LH: loop header
LB: loop body
LE: loop exit
PB: predicated region body
PF: predicated region fallthrough
CT: control target
= control target key end

     0   :  { %10 = vsyncpa [#allocation4], 0  ;;  %s539_s0 = inlined_call_operand.hbm [shape: bf16[16,128], index: 0, kind: input, shape index: {}]   ;;  %s540_s1 = inlined_call_operand.hbm [shape: bf16[128,128], index: 1, kind: input, shape index: {}]   ;;  %s541_s2 = inlined_call_operand.vmem [shape: f32[1,128], index: 2, kind: input, shape index: {}]   ;;  %s542_s3 = inlined_call_operand.hbm [shape: bf16[128,128], index: 3, kind: input, shape index: {}]   ;;  %s543_s4 = inlined_call_operand.vmem [shape: f32[1,128], index: 4, kind: input, shape index: {}]   ;;  %s544_s5 = inlined_call_operand.hbm [shape: f32[16,128], index: 5, kind: output, shape index: {}]  }
   0x1   :  { %11 = vsyncpa [#allocation7], 0 }
   0x2   :  { %12 = vsyncpa [#allocation5], 0  ;;  %s30_s20 = sshll.u32 %s540_s1, 4  ;;  %s483_s21 = smov [#allocation6]   ;;  %s31_s20 = int_to_ptr.hbm [resolvable:$true] %s30_s20 }
   0x3   :  { %s32_s22 = sshll.u32 %s483_s21, 4  ;;  %s17_s25 = sshll.u32 %s539_s0, 4  ;;  %s33_s22 = int_to_ptr.vmem [resolvable:$true] %s32_s22  ;;  %s18_s25 = int_to_ptr.hbm [resolvable:$true] %s17_s25 }
   0x4   :  { %s484_s26 = smov 64   ;;  %s485_s27 = smov 4  }
   0x5   :  { %38 = dma.hbm_to_vmem [thread:$0]  %s31_s20, 1024, %s33_s22, [#allocation7], %s484_s26, %s484_s26, %s485_s27  }
   0x6   :  { %s486_s28 = smov [#allocation3]   ;;  %s45_s7 = sshll.u32 %s542_s3, 4  ;;  %s46_s7 = int_to_ptr.hbm [resolvable:$true] %s45_s7 }
   0x7   :  { %s19_s29 = sshll.u32 %s486_s28, 4  ;;  %s487_s1 = smov [#allocation8]   ;;  %s20_s29 = int_to_ptr.vmem [resolvable:$true] %s19_s29 }
   0x8   :  { %25 = dma.hbm_to_vmem [thread:$0]  %s18_s25, 128, %s20_s29, [#allocation4], %s484_s26, %s484_s26, %s485_s27  }
   0x9   :  { %s47_s8 = sshll.u32 %s487_s1, 4  ;;  %s48_s8 = int_to_ptr.vmem [resolvable:$true] %s47_s8 }
   0xa   :  { %53 = dma.hbm_to_vmem [thread:$0]  %s46_s7, 1024, %s48_s8, [#allocation7], %s484_s26, %s484_s26, %s485_s27  }
   0xb   :  { %477 = dma.done.wait [#allocation4], 128  }
   0xc   :  { %478 = vsyncadd [#allocation4], 4294967168 }
   0xd   :  { %479 = dma.done.wait [#allocation7], 2048  }
   0xe   :  { %480 = vsyncadd [#allocation7], 4294965248  ;;  %v362_v0 = vld [vmem:[#allocation6 + $0x38] sm:$0xff]  ;;  %v361_v1 = vld [vmem:[#allocation6 + $0x30] sm:$0xff]  ;;  %s488_s11 = smov [#allocation9]   ;;  %s489_s15 = smov 128  }
   0xf   :  { %148 = vmatpush.bf16.msra.mxu0 %v362_v0  ;;  %v370_v2 = vld [vmem:[#allocation8 + $0x38] sm:$0xff]  ;;  %v369_v3 = vld [vmem:[#allocation8 + $0x30] sm:$0xff]  ;;  %v360_v4 = vld [vmem:[#allocation6 + $0x28] sm:$0xff]  ;;  %s270_s12 = sshll.u32 %s488_s11, 4  ;;  %s490_s16 = smov 8   ;;  %s271_s12 = int_to_ptr.vmem [resolvable:$true] %s270_s12 }
  0x10   :  { %248 = vmatpush.bf16.msra.mxu1 %v370_v2  ;;  %v368_v5 = vld [vmem:[#allocation8 + $0x28] sm:$0xff]  ;;  %v359_v6 = vld [vmem:[#allocation6 + $0x20] sm:$0xff]  ;;  %v358_v8 = vld [vmem:[#allocation6 + $0x18] sm:$0xff] }
  0x11   :  { %v367_v7 = vld [vmem:[#allocation8 + $0x20] sm:$0xff]  ;;  %v357_v9 = vld [vmem:[#allocation6 + $0x10] sm:$0xff]  ;;  %v356_v10 = vld [vmem:[#allocation6 + $0x8] sm:$0xff] }
  0x12   :  { %v355_v11 = vld [vmem:[#allocation6] sm:$0xff]  ;;  %v354_v12 = vld [vmem:[#allocation3] sm:$0xff]  ;;  %v365_v14 = vld [vmem:[#allocation8 + $0x10] sm:$0xff] }
  0x13   :  { %149 = vmatpush.bf16.msra.mxu0 %v361_v1  ;;  %v366_v13 = vld [vmem:[#allocation8 + $0x18] sm:$0xff]  ;;  %v364_v15 = vld [vmem:[#allocation8 + $0x8] sm:$0xff]  ;;  %v363_v16 = vld [vmem:[#allocation8] sm:$0xff] }
  0x14   :  { %249 = vmatpush.bf16.msra.mxu1 %v369_v3  ;;  %v379_v18 = vld [vmem:[%s541_s2] ss:$0 sm:$0xff]  ;;  %s272_s2 = sshll.u32 %s544_s5, 4  ;;  %s273_s2 = int_to_ptr.hbm [resolvable:$true] %s272_s2 }
  0x15   :  { %v380_v25 = vld [vmem:[%s543_s4] ss:$0 sm:$0xff] }
  0x17   :  { %150 = vmatpush.bf16.msra.mxu0 %v360_v4 }
  0x18   :  { %250 = vmatpush.bf16.msra.mxu1 %v368_v5 }
  0x1b   :  { %151 = vmatpush.bf16.msra.mxu0 %v359_v6 }
  0x1c   :  { %251 = vmatpush.bf16.msra.mxu1 %v367_v7 }
  0x1f   :  { %152 = vmatpush.bf16.msra.mxu0 %v358_v8 }
  0x20   :  { %252 = vmatpush.bf16.msra.mxu1 %v366_v13 }
  0x23   :  { %153 = vmatpush.bf16.msra.mxu0 %v357_v9 }
  0x24   :  { %253 = vmatpush.bf16.msra.mxu1 %v365_v14 }
  0x27   :  { %154 = vmatpush.bf16.msra.mxu0 %v356_v10 }
  0x28   :  { %254 = vmatpush.bf16.msra.mxu1 %v364_v15 }
  0x2b   :  { %155 = vmatpush.bf16.msra.mxu0 %v355_v11 }
  0x2c   :  { %255 = vmatpush.bf16.msra.mxu1 %v363_v16 }
  0x2e   :  { %156 = vmatmul.bf16.vlgmr.msra.gmra.mxu0 %v354_v12 }
  0xab   :  { %v157_v17 = vpop.f32.mrf.mxu0 }
  0xac   :  { %v175_v19 = vadd.f32 %v379_v18, %v157_v17 }
  0xae   :  { %v177_v22 = vmax.f32 %v175_v19, 0.0 }
  0xb3   :  { %v159_v20 = vpop.f32.mrf.mxu0 }
  0xb4   :  { %v176_v21 = vadd.f32 %v379_v18, %v159_v20 }
  0xb6   :  { %v178_v23 = vmax.f32 %v176_v21, 0.0 }
  0xb8   :  { %v179_v24 = vpack.c.bf16 %v178_v23, %v177_v22 }
  0xba   :  { %256 = vmatmul.bf16.vlgmr.msra.gmra.mxu1 %v179_v24 }
 0x137   :  { %v257_v26 = vpop.f32.mrf.mxu1 }
 0x138   :  { %v258_v27 = vadd.f32 %v380_v25, %v257_v26 }
 0x13a   :  { %v262_v28 = vmax.f32 %v258_v27, 0.0 }
 0x13c   :  { %264 = vst [vmem:[#allocation9] sm:$0xff] %v262_v28 }
 0x13f   :  { %v259_v29 = vpop.f32.mrf.mxu1 }
 0x140   :  { %v260_v30 = vadd.f32 %v380_v25, %v259_v29 }
 0x142   :  { %v263_v31 = vmax.f32 %v260_v30, 0.0 }
 0x144   :  { %265 = vst [vmem:[#allocation9 + $0x8] sm:$0xff] %v263_v31 }
 0x145   :  { %278 = dma.vmem_to_hbm [thread:$0]  %s271_s12, 256, %s273_s2, [#allocation5], %s489_s15, %s489_s15, %s490_s16  }
 0x146   :  { %481 = dma.done.wait [#allocation5], 256  }
 0x147   :  { %482 = vsyncadd [#allocation5], 4294967040 }
 0x148   :  { %283 = vsyncpa [#allocation4], 1 }
 0x149   :  { %284 = vsyncpa [#allocation7], 1 }
 0x14a   :  { %285 = vsyncpa [#allocation5], 1 }

</bundles_post_ra>
